<compile_context>
chip_gen: v6e
topology: v6e:2x2x1
jax: 0.10.0
libtpu: 0.0.40
codegen_flags: <defaults>
</compile_context>

<pallas_src>
import jax
import jax.numpy as jnp
from jax.experimental import pallas as pl
from jax.experimental.pallas import tpu as pltpu


def _round_up(x, m):
    return (x + m - 1) // m * m


def _single_feature_kernel(ex_ref, rec_ref, w1e_ref, w1r_ref, b1_ref, w2_ref,
                           b2_ref, o_ref):
    # First Linear with the torch.cat decomposed away:
    #   h = ex @ w1[:F]  +  rec * w1[F:F+1]  +  b1     (f32 accumulation, MXU+VPU)
    h = jnp.dot(ex_ref[...], w1e_ref[...], preferred_element_type=jnp.float32)
    h = h + rec_ref[...].astype(jnp.float32) * w1r_ref[...] + b1_ref[...]
    h = jnp.maximum(h, 0.0)
    # Second Linear has output width 1 -> VPU multiply + XLU lane reduction
    # (avoids a 1/128-lane-wide MXU matmul).
    y = jnp.sum(h * w2_ref[...], axis=-1) + b2_ref[0, 0]          # (TM,)
    # Lane-dense store: one (1, TM) row per grid step (TM % 128 == 0).
    o_ref[...] = y.reshape(1, -1).astype(o_ref.dtype)


def single_feature_model(example_records, record_to_classify, params):
    """example_records: (N, F) f32; record_to_classify: (N,) f32 -> (N,) f32."""
    n, f = example_records.shape
    w1, b1, w2, b2 = params
    hdim = w1.shape[1]

    # Split the first-layer weight once:  cat(ex, rec) @ w1 == ex@w1[:F] + rec*w1[F]
    w1_ex = w1[:f].astype(jnp.bfloat16)               # (F, H)  MXU operand
    w1_rec = w1[f:f + 1].astype(jnp.float32)          # (1, H)  VPU operand
    b1 = b1.reshape(1, hdim).astype(jnp.float32)      # (1, H)
    w2_row = w2.reshape(1, hdim).astype(jnp.float32)  # (1, H)
    b2 = b2.reshape(1, 1).astype(jnp.float32)         # scalar -> SMEM

    # Row tile: lane-dense (multiple of 128), capped at 1024 so the
    # double-buffered tiles stay far below every chip's scoped-VMEM default
    # (16 MiB v5e / 32 MiB v6e, v7x).
    tm = min(1024, _round_up(max(n, 1), 128))
    n_pad = _round_up(n, tm)
    g = n_pad // tm

    ex = example_records.astype(jnp.bfloat16)
    rec = record_to_classify.reshape(-1, 1).astype(jnp.bfloat16)
    if n_pad != n:                                     # remainder tile -> zero pad
        ex = jnp.pad(ex, ((0, n_pad - n), (0, 0)))
        rec = jnp.pad(rec, ((0, n_pad - n), (0, 0)))

    out = pl.pallas_call(
        _single_feature_kernel,
        out_shape=jax.ShapeDtypeStruct((g, tm), jnp.float32),
        grid_spec=pltpu.PrefetchScalarGridSpec(
            num_scalar_prefetch=0,
            grid=(g,),
            in_specs=[
                pl.BlockSpec((tm, f), lambda i: (i, 0)),     # ex tile
                pl.BlockSpec((tm, 1), lambda i: (i, 0)),     # rec tile
                pl.BlockSpec((f, hdim), lambda i: (0, 0)),   # w1[:F]   (resident)
                pl.BlockSpec((1, hdim), lambda i: (0, 0)),   # w1[F]    (resident)
                pl.BlockSpec((1, hdim), lambda i: (0, 0)),   # b1       (resident)
                pl.BlockSpec((1, hdim), lambda i: (0, 0)),   # w2 row   (resident)
                pl.BlockSpec(memory_space=pltpu.SMEM),       # b2 scalar
            ],
            out_specs=pl.BlockSpec((1, tm), lambda i: (i, 0)),
        ),
        compiler_params=pltpu.CompilerParams(
            dimension_semantics=("parallel",),               # 2 TCs on v7x
            vmem_limit_bytes=32 * 1024 * 1024,
        ),
    )(ex, rec, w1_ex, w1_rec, b1, w2_row, b2)

    return out.reshape(-1)[:n]                               # .view(-1)


def init_params(key, in_features, hidden):
    k1, k2, k3, k4 = jax.random.split(key, 4)
    lim1 = 1.0 / jnp.sqrt(in_features)
    lim2 = 1.0 / jnp.sqrt(hidden)
    w1 = jax.random.uniform(k1, (in_features, hidden), jnp.float32, -lim1, lim1)
    b1 = jax.random.uniform(k2, (1, hidden), jnp.float32, -lim1, lim1)
    w2 = jax.random.uniform(k3, (hidden, 1), jnp.float32, -lim2, lim2)
    b2 = jax.random.uniform(k4, (1, 1), jnp.float32, -lim2, lim2)
    return w1, b1, w2, b2


def _reference_f32(example_records, record_to_classify, params):
    """Exact f32 semantics of the PyTorch module."""
    w1, b1, w2, b2 = params
    x = jnp.concatenate([example_records, record_to_classify.reshape(-1, 1)], axis=1)
    h = jnp.maximum(x @ w1 + b1, 0.0)
    return (h @ w2 + b2).reshape(-1)


def _reference_matched(example_records, record_to_classify, params):
    """Same math as the kernel (bf16 inputs, f32 accumulation) for a tight check."""
    w1, b1, w2, b2 = params
    f = example_records.shape[1]
    h = jnp.dot(example_records.astype(jnp.bfloat16), w1[:f].astype(jnp.bfloat16),
                preferred_element_type=jnp.float32)
    rec = record_to_classify.reshape(-1, 1).astype(jnp.bfloat16).astype(jnp.float32)
    h = jnp.maximum(h + rec * w1[f:f + 1] + b1.reshape(1, -1), 0.0)
    return jnp.sum(h * w2.reshape(1, -1), axis=-1) + b2.reshape(())


if __name__ == "__main__":
    N, F, H = 8, 7, 32          # batch, example-feature count, hidden width
    key = jax.random.PRNGKey(0)
    k_ex, k_rec, k_par = jax.random.split(key, 3)

    example_records = jax.random.normal(k_ex, (N, F), jnp.float32)
    record_to_classify = jax.random.normal(k_rec, (N,), jnp.float32)
    params = init_params(k_par, F + 1, H)

    out = single_feature_model(example_records, record_to_classify, params)
    out = jax.block_until_ready(out)

    assert out.shape == (N,)
    ref_m = _reference_matched(example_records, record_to_classify, params)
    ref_f = _reference_f32(example_records, record_to_classify, params)
    # Tight check against a bf16-matched reference; loose check against pure f32
    # (inputs/first-layer weights are deliberately cast to bf16 for bandwidth).
    assert jnp.allclose(out, ref_m, atol=1e-4, rtol=1e-4)
    assert jnp.allclose(out, ref_f, atol=5e-2, rtol=5e-2)
    print("KERNEL_OK")
</pallas_src>

<mosaic_0001>
module attributes {stable_mosaic.version = 11 : i64} {
  func.func @_single_feature_kernel(%arg0: i32, %arg1: memref<128x7xbf16, #tpu.memory_space<vmem>>, %arg2: memref<128x1xbf16, #tpu.memory_space<vmem>>, %arg3: memref<7x32xbf16, #tpu.memory_space<vmem>>, %arg4: memref<1x32xf32, #tpu.memory_space<vmem>>, %arg5: memref<1x32xf32, #tpu.memory_space<vmem>>, %arg6: memref<1x32xf32, #tpu.memory_space<vmem>>, %arg7: memref<1x1xf32, #tpu.memory_space<smem>>, %arg8: memref<1x128xf32, #tpu.memory_space<vmem>>) attributes {dimension_semantics = [#tpu.dimension_semantics<parallel>], iteration_bounds = array<i64: 1>, scalar_prefetch = 0 : i64, scratch_operands = 0 : i64, tpu.core_type = #tpu.core_type<tc>, window_params = [{transform_indices = @transform_0, window_bounds = array<i64: 128, 7>}, {transform_indices = @transform_1, window_bounds = array<i64: 128, 1>}, {pipeline_mode = #tpu.pipeline_mode<synchronous>, transform_indices = @transform_2, window_bounds = array<i64: 7, 32>}, {pipeline_mode = #tpu.pipeline_mode<synchronous>, transform_indices = @transform_3, window_bounds = array<i64: 1, 32>}, {pipeline_mode = #tpu.pipeline_mode<synchronous>, transform_indices = @transform_4, window_bounds = array<i64: 1, 32>}, {pipeline_mode = #tpu.pipeline_mode<synchronous>, transform_indices = @transform_5, window_bounds = array<i64: 1, 32>}, {transform_indices = @transform_6, window_bounds = array<i64: 1, 1>}, {transform_indices = @transform_7, window_bounds = array<i64: 1, 128>}]} {
    %c0 = arith.constant 0 : index
    %c0_0 = arith.constant 0 : index
    %0 = vector.load %arg1[%c0, %c0_0] : memref<128x7xbf16, #tpu.memory_space<vmem>>, vector<128x7xbf16>
    %c0_1 = arith.constant 0 : index
    %c0_2 = arith.constant 0 : index
    %1 = vector.load %arg3[%c0_1, %c0_2] : memref<7x32xbf16, #tpu.memory_space<vmem>>, vector<7x32xbf16>
    %cst = arith.constant dense<0.000000e+00> : vector<128x32xf32>
    %2 = tpu.matmul %0, %1, %cst {dimension_numbers = #tpu.dot_dimension_numbers<[1], [0], [0], [1], [0, 0, 1, 1], [], []>} : vector<128x7xbf16>, vector<7x32xbf16>, vector<128x32xf32> -> vector<128x32xf32>
    %c0_3 = arith.constant 0 : index
    %c0_4 = arith.constant 0 : index
    %3 = vector.load %arg2[%c0_3, %c0_4] : memref<128x1xbf16, #tpu.memory_space<vmem>>, vector<128x1xbf16>
    %4 = arith.extf %3 : vector<128x1xbf16> to vector<128x1xf32>
    %c0_5 = arith.constant 0 : index
    %c0_6 = arith.constant 0 : index
    %5 = vector.load %arg4[%c0_5, %c0_6] : memref<1x32xf32, #tpu.memory_space<vmem>>, vector<1x32xf32>
    %6 = vector.broadcast %4 : vector<128x1xf32> to vector<128x32xf32>
    %7 = vector.broadcast %5 : vector<1x32xf32> to vector<128x32xf32>
    %8 = arith.mulf %6, %7 : vector<128x32xf32>
    %9 = arith.addf %2, %8 : vector<128x32xf32>
    %c0_7 = arith.constant 0 : index
    %c0_8 = arith.constant 0 : index
    %10 = vector.load %arg5[%c0_7, %c0_8] : memref<1x32xf32, #tpu.memory_space<vmem>>, vector<1x32xf32>
    %11 = vector.broadcast %10 : vector<1x32xf32> to vector<128x32xf32>
    %12 = arith.addf %9, %11 : vector<128x32xf32>
    %cst_9 = arith.constant 0.000000e+00 : f32
    %13 = vector.broadcast %cst_9 : f32 to vector<128x32xf32>
    %14 = arith.maximumf %12, %13 : vector<128x32xf32>
    %c0_10 = arith.constant 0 : index
    %c0_11 = arith.constant 0 : index
    %15 = vector.load %arg6[%c0_10, %c0_11] : memref<1x32xf32, #tpu.memory_space<vmem>>, vector<1x32xf32>
    %16 = vector.broadcast %15 : vector<1x32xf32> to vector<128x32xf32>
    %17 = arith.mulf %14, %16 : vector<128x32xf32>
    %cst_12 = arith.constant dense<0.000000e+00> : vector<128xf32>
    %18 = vector.multi_reduction <add>, %17, %cst_12 [1] : vector<128x32xf32> to vector<128xf32>
    %c0_13 = arith.constant 0 : index
    %c0_14 = arith.constant 0 : index
    %19 = memref.load %arg7[%c0_13, %c0_14] : memref<1x1xf32, #tpu.memory_space<smem>>
    %20 = vector.broadcast %19 : f32 to vector<128xf32>
    %21 = arith.addf %18, %20 : vector<128xf32>
    %22 = vector.shape_cast %21 : vector<128xf32> to vector<1x128xf32>
    %c0_15 = arith.constant 0 : index
    %c0_16 = arith.constant 0 : index
    %23 = vector.load %arg8[%c0_15, %c0_16] : memref<1x128xf32, #tpu.memory_space<vmem>>, vector<1x128xf32>
    tpu.vector_store %arg8[%c0_15, %c0_16], %22 {strides = array<i32>} : memref<1x128xf32, #tpu.memory_space<vmem>>, vector<1x128xf32>,
    return
  }
  func.func @transform_0(%arg0: i32) -> (i32, i32) {
    %c0_i32 = arith.constant 0 : i32
    %c0_i32_0 = arith.constant 0 : i32
    return %arg0, %c0_i32 : i32, i32
  }
  func.func @transform_1(%arg0: i32) -> (i32, i32) {
    %c0_i32 = arith.constant 0 : i32
    %c0_i32_0 = arith.constant 0 : i32
    return %arg0, %c0_i32 : i32, i32
  }
  func.func @transform_2(%arg0: i32) -> (i32, i32) {
    %c0_i32 = arith.constant 0 : i32
    %c0_i32_0 = arith.constant 0 : i32
    %c0_i32_1 = arith.constant 0 : i32
    return %c0_i32, %c0_i32_0 : i32, i32
  }
  func.func @transform_3(%arg0: i32) -> (i32, i32) {
    %c0_i32 = arith.constant 0 : i32
    %c0_i32_0 = arith.constant 0 : i32
    %c0_i32_1 = arith.constant 0 : i32
    return %c0_i32, %c0_i32_0 : i32, i32
  }
  func.func @transform_4(%arg0: i32) -> (i32, i32) {
    %c0_i32 = arith.constant 0 : i32
    %c0_i32_0 = arith.constant 0 : i32
    %c0_i32_1 = arith.constant 0 : i32
    return %c0_i32, %c0_i32_0 : i32, i32
  }
  func.func @transform_5(%arg0: i32) -> (i32, i32) {
    %c0_i32 = arith.constant 0 : i32
    %c0_i32_0 = arith.constant 0 : i32
    %c0_i32_1 = arith.constant 0 : i32
    return %c0_i32, %c0_i32_0 : i32, i32
  }
  func.func @transform_6(%arg0: i32) -> (i32, i32) {
    %c0_i32 = arith.constant 0 : i32
    %c0_i32_0 = arith.constant 0 : i32
    %c0_i32_1 = arith.constant 0 : i32
    return %c0_i32, %c0_i32_0 : i32, i32
  }
  func.func @transform_7(%arg0: i32) -> (i32, i32) {
    %c0_i32 = arith.constant 0 : i32
    %c0_i32_0 = arith.constant 0 : i32
    return %arg0, %c0_i32 : i32, i32
  }
}

</mosaic_0001>

<bundles_post_ra>
// kernel: tpu_custom_call.1
= control target key start
LH: loop header
LB: loop body
LE: loop exit
PB: predicated region body
PF: predicated region fallthrough
CT: control target
= control target key end

     0   :  { %vm246_vm0 = vcmask 1042432   ;;  %vm247_vm1 = vcmask 1043456   ;;  %v784_v2 = vmov 65535   ;;  %vm221_vm2 = vcmask 56320   ;;  %s1049_s0 = inlined_call_operand.vmem [shape: bf16[128,7], index: 0, kind: input, shape index: {}]   ;;  %s1050_s1 = inlined_call_operand.vmem [shape: bf16[128,1], index: 1, kind: input, shape index: {}]   ;;  %s1051_s2 = inlined_call_operand.vmem [shape: bf16[7,32], index: 2, kind: input, shape index: {}]   ;;  %s1052_s3 = inlined_call_operand.vmem [shape: f32[1,32], index: 3, kind: input, shape index: {}]   ;;  %s1053_s4 = inlined_call_operand.vmem [shape: f32[1,32], index: 4, kind: input, shape index: {}]   ;;  %s1054_s5 = inlined_call_operand.vmem [shape: f32[1,32], index: 5, kind: input, shape index: {}]   ;;  %s1055_s6 = inlined_call_operand.<no memory space> [shape: f32[1,1], index: 6, kind: input, shape index: {}]   ;;  %s1056_s7 = inlined_call_operand.hbm [shape: f32[1,128], index: 7, kind: output, shape index: {}]  }
   0x1   :  { %v45_v0 = vld [vmem:[%s1051_s2] sm:$0xf]  ;;  %v248_v3 = vsel %vm246_vm0, 4294967295, %v784_v2  ;;  %v756_v7 = vld [vmem:[%s1049_s0 + $0x8] sm:$0xff]   ;;  %v785_v9 = vmov 0   ;;  %v758_v10 = vld [vmem:[%s1049_s0 + $0x10] sm:$0xff]  }
   0x2   :  { %v754_v1 = vld [vmem:[%s1049_s0] sm:$0xff]   ;;  %v249_v4 = vsel %vm247_vm1, %v248_v3, 0  ;;  %v757_v8 = vld [vmem:[%s1049_s0 + $0x28] sm:$0xff]   ;;  %712 = vset.pattern.permute.xlu0 %v785_v9  ;;  %v759_v11 = vld [vmem:[%s1049_s0 + $0x30] sm:$0xff]   ;;  %723 = vset.pattern.permute.xlu1 %v785_v9 }
   0x3   :  { %691 = vmatprep.mubr.msk.bf16.mxu0 %vm221_vm2, %v754_v1  ;;  %v755_v5 = vld [vmem:[%s1049_s0 + $0x20] sm:$0xff]   ;;  %v251_v6 = vand.u32 %v249_v4, %v45_v0  ;;  %v673_v13 = vld [vmem:[%s1050_s1 + $0x8] sm:$0xff]   ;;  %v674_v18 = vld [vmem:[%s1050_s1 + $0x10] sm:$0xff]  }
   0x4   :  { %699 = vmatprep.mubr.msk.bf16.mxu1 %vm221_vm2, %v755_v5  ;;  %v642_v12 = vld [vmem:[%s1050_s1] sm:$0xff]   ;;  %v647_v16 = vunpack.c.l.bf16 %v673_v13  ;;  %v648_v17 = vunpack.c.h.bf16 %v673_v13  ;;  %v675_v19 = vld [vmem:[%s1050_s1 + $0x18] sm:$0xff]  }
   0x5   :  { %689 = vmatprep.subr.bf16.mxu0 %v251_v6  ;;  %707 = vmatprep.subr.bf16.mxu1 %v251_v6  ;;  %v643_v14 = vunpack.c.l.bf16 %v642_v12  ;;  %v644_v15 = vunpack.c.h.bf16 %v642_v12  ;;  %v676_v20 = vld [vmem:[%s1050_s1 + $0x20] sm:$0xff]  }
   0x6   :  { %690 = vmatpush3.bf16.msra.mxu0 %v251_v6  ;;  %708 = vmatpush3.bf16.msra.mxu1 %v251_v6 }
   0x9   :  { %692 = vmatmul.mubr.msk.bf16.vlgmr.msra.gmra.mxu0 %vm221_vm2, %v756_v7  ;;  %700 = vmatmul.mubr.msk.bf16.vlgmr.msra.gmra.mxu1 %vm221_vm2, %v757_v8 }
   0xa   :  { %695 = vmatprep.mubr.msk.bf16.mxu0 %vm221_vm2, %v758_v10  ;;  %703 = vmatprep.mubr.msk.bf16.mxu1 %vm221_vm2, %v759_v11 }
   0xb   :  { %13 = vsyncpa [#allocation4], 0  ;;  %v713_v21 = vpack.i.bf16 %v644_v15, %v643_v14  ;;  %v651_v22 = vunpack.c.l.bf16 %v674_v18  ;;  %v652_v23 = vunpack.c.h.bf16 %v674_v18  ;;  %v760_v24 = vld [vmem:[%s1049_s0 + $0x18] sm:$0xff]   ;;  %v655_v26 = vunpack.c.l.bf16 %v675_v19  ;;  %v677_v28 = vld [vmem:[%s1050_s1 + $0x28] sm:$0xff]  }
   0xc   :  { %v761_v25 = vld [vmem:[%s1049_s0 + $0x38] sm:$0xff]   ;;  %v656_v27 = vunpack.c.h.bf16 %v675_v19  ;;  %v718_v29 = vpack.i.bf16 %v648_v17, %v647_v16  ;;  %v659_v30 = vunpack.c.l.bf16 %v676_v20  ;;  %v660_v31 = vunpack.c.h.bf16 %v676_v20  ;;  %v678_v33 = vld [vmem:[%s1050_s1 + $0x30] sm:$0xff]   ;;  %v889_v52 = vld [vmem:[%s1052_s3] ss:$0 sm:$0xff] }
   0xd   :  { %714 = vperm.xlu0 %712, %v713_v21   ;;  %v724_v32 = vpack.i.bf16 %v652_v23, %v651_v22  ;;  %v663_v35 = vunpack.c.l.bf16 %v677_v28  ;;  %v664_v36 = vunpack.c.h.bf16 %v677_v28  ;;  %v679_v37 = vld [vmem:[%s1050_s1 + $0x38] sm:$0xff]   ;;  %v667_v39 = vunpack.c.l.bf16 %v678_v33  ;;  %v897_v61 = vld [vmem:[%s1053_s4] ss:$0 sm:$0xff] }
   0xe   :  { %v729_v34 = vpack.i.bf16 %v656_v27, %v655_v26  ;;  %v734_v38 = vpack.i.bf16 %v660_v31, %v659_v30  ;;  %v668_v40 = vunpack.c.h.bf16 %v678_v33  ;;  %v671_v42 = vunpack.c.l.bf16 %v679_v37  ;;  %v915_v22 = vld [vmem:[%s1054_s5] ss:$0 sm:$0xff] }
   0xf   :  { %725 = vperm.xlu1 %723, %v724_v32   ;;  %v739_v41 = vpack.i.bf16 %v664_v36, %v663_v35  ;;  %v672_v43 = vunpack.c.h.bf16 %v679_v37  ;;  %vm412_vm3 = vcmask 261120   ;;  %vm506_vm4 = vcmask 130112  }
  0x10   :  { %v744_v44 = vpack.i.bf16 %v668_v40, %v667_v39  ;;  %vm513_vm5 = vcmask 195712   ;;  %vm520_vm6 = vcmask 261312   ;;  %vm527_vm7 = vcmask 326912  }
  0x11   :  { %696 = vmatmul.mubr.msk.bf16.gmra.mxu0 %vm221_vm2, %v760_v24  ;;  %704 = vmatmul.mubr.msk.bf16.gmra.mxu1 %vm221_vm2, %v761_v25  ;;  %v749_v45 = vpack.i.bf16 %v672_v43, %v671_v42  ;;  %vm534_vm8 = vcmask 392512   ;;  %vm541_vm9 = vcmask 458112   ;;  %vm548_vm10 = vcmask 523712  }
  0x12   :  { %719 = vperm.xlu0 %712, %v718_v29   ;;  %vm555_vm11 = vcmask 589312   ;;  %vm562_vm12 = vcmask 654912   ;;  %vm569_vm13 = vcmask 720512   ;;  %vm576_vm14 = vcmask 786112  }
  0x13   :  { %730 = vperm.xlu1 %723, %v729_v34   ;;  %vm583_vm15 = vcmask 851712   ;;  %vm590_vm0 = vcmask 917312   ;;  %vm597_vm1 = vcmask 982912   ;;  %vm604_vm2 = vcmask 1048512  }
  0x16   :  { %735 = vperm.xlu0 %712, %v734_v38  }
  0x17   :  { %740 = vperm.xlu1 %723, %v739_v41  }
  0x1a   :  { %745 = vperm.xlu0 %712, %v744_v44  }
  0x1b   :  { %750 = vperm.xlu1 %723, %v749_v45  }
  0x88   :  { %v715_v46 = vpop.permute.xlu0 %714 }
  0x89   :  { %v716_v53 = vunpack.i.l.bf16 %v715_v46  ;;  %v717_v58 = vunpack.i.h.bf16 %v715_v46 }
  0x8a   :  { %v726_v47 = vpop.permute.xlu1 %725 }
  0x8b   :  { %v728_v63 = vunpack.i.h.bf16 %v726_v47  ;;  %v165_v1 = vmul.f32 %v716_v53, %v889_v52  ;;  %v727_v4 = vunpack.i.l.bf16 %v726_v47  ;;  %v166_v15 = vmul.f32 %v717_v58, %v889_v52 }
  0x8d   :  { %v720_v48 = vpop.permute.xlu0 %719  ;;  %v169_v26 = vmul.f32 %v727_v4, %v889_v52  ;;  %v170_v27 = vmul.f32 %v728_v63, %v889_v52 }
  0x8e   :  { %v731_v49 = vpop.permute.xlu1 %730  ;;  %v721_v50 = vunpack.i.l.bf16 %v720_v48  ;;  %v722_v55 = vunpack.i.h.bf16 %v720_v48 }
  0x8f   :  { %v732_v59 = vunpack.i.l.bf16 %v731_v49  ;;  %v733_v5 = vunpack.i.h.bf16 %v731_v49 }
  0x90   :  { %v167_v56 = vmul.f32 %v721_v50, %v889_v52  ;;  %v168_v8 = vmul.f32 %v722_v55, %v889_v52 }
  0x91   :  { %v736_v51 = vpop.permute.xlu0 %735  ;;  %v171_v16 = vmul.f32 %v732_v59, %v889_v52  ;;  %v172_v32 = vmul.f32 %v733_v5, %v889_v52 }
  0x92   :  { %v737_v54 = vunpack.i.l.bf16 %v736_v51  ;;  %v892_v57 = vpop.permute.xlu1 %740  ;;  %v738_v3 = vunpack.i.h.bf16 %v736_v51 }
  0x93   :  { %v742_v10 = vunpack.i.l.bf16 %v892_v57  ;;  %v743_v40 = vunpack.i.h.bf16 %v892_v57 }
  0x94   :  { %v173_v2 = vmul.f32 %v737_v54, %v889_v52  ;;  %v174_v24 = vmul.f32 %v738_v3, %v889_v52 }
  0x95   :  { %v908_v17 = vpop.permute.xlu0 %745  ;;  %v175_v28 = vmul.f32 %v742_v10, %v889_v52  ;;  %v176_v59 = vmul.f32 %v743_v40, %v889_v52 }
  0x96   :  { %v921_v31 = vpop.permute.xlu1 %750  ;;  %v747_v39 = vunpack.i.l.bf16 %v908_v17  ;;  %v748_v43 = vunpack.i.h.bf16 %v908_v17 }
  0x97   :  { %v752_v50 = vunpack.i.l.bf16 %v921_v31 }
  0x99   :  { %v179_v5 = vmul.f32 %v752_v50, %v889_v52 }
  0xc9   :  { %v693_v60 = vpop.f32.mrf.mxu0  ;;  %v701_v62 = vpop.f32.mrf.mxu1 }
  0xca   :  { %v296_v0 = vadd.f32 %v693_v60, %v167_v56  ;;  %v328_v48 = vadd.f32 %v701_v62, %v175_v28  ;;  %v177_v62 = vmul.f32 %v747_v39, %v889_v52 }
  0xcb   :  { %v287_v6 = vpop.f32.mrf.mxu0  ;;  %v319_v7 = vpop.f32.mrf.mxu1 }
  0xcc   :  { %v359_v9 = vadd.f32 %v897_v61, %v296_v0  ;;  %v288_v11 = vadd.f32 %v287_v6, %v165_v1  ;;  %v320_v12 = vadd.f32 %v319_v7, %v173_v2 }
  0xcd   :  { %v694_v13 = vpop.f32.mrf.mxu0  ;;  %v904_v14 = vpop.f32.mrf.mxu1 }
  0xce   :  { %v375_v18 = vmax.f32 %v359_v9, 0.0  ;;  %v357_v19 = vadd.f32 %v897_v61, %v288_v11  ;;  %v365_v20 = vadd.f32 %v897_v61, %v320_v12  ;;  %v299_v21 = vadd.f32 %v694_v13, %v168_v8 }
  0xcf   :  { %v290_v23 = vpop.f32.mrf.mxu0  ;;  %v322_v25 = vpop.f32.mrf.mxu1  ;;  %v367_v9 = vadd.f32 %v897_v61, %v328_v48 }
  0xd0   :  { %v381_v29 = vmax.f32 %v365_v20, 0.0  ;;  %v291_v30 = vadd.f32 %v290_v23, %v166_v15  ;;  %v373_v33 = vmax.f32 %v357_v19, 0.0  ;;  %v360_v34 = vadd.f32 %v897_v61, %v299_v21 }
  0xd1   :  { %v323_v35 = vadd.f32 %v322_v25, %v174_v24  ;;  %v697_v36 = vpop.f32.mrf.mxu0  ;;  %v705_v37 = vpop.f32.mrf.mxu1  ;;  %v398_v38 = vmul.f32 %v915_v22, %v375_v18  ;;  %v331_v15 = vadd.f32 %v904_v14, %v176_v59  ;;  %v178_v23 = vmul.f32 %v748_v43, %v889_v52 }
  0xd2   :  { %v358_v41 = vadd.f32 %v897_v61, %v291_v30  ;;  %v312_v42 = vadd.f32 %v697_v36, %v171_v16  ;;  %v404_v47 = vmul.f32 %v915_v22, %v381_v29  ;;  %v376_v54 = vmax.f32 %v360_v34, 0.0 }
  0xd3   :  { %v366_v44 = vadd.f32 %v897_v61, %v323_v35  ;;  %v419_v45 = vsel %vm412_vm3, %v398_v38, 0.0  ;;  %v303_v46 = vpop.f32.mrf.mxu0  ;;  %v335_v53 = vpop.f32.mrf.mxu1  ;;  %v396_v58 = vmul.f32 %v915_v22, %v373_v33  ;;  %v753_v16 = vunpack.i.h.bf16 %v921_v31 }
  0xd4   :  { %v374_v49 = vmax.f32 %v358_v41, 0.0  ;;  %v363_v51 = vadd.f32 %v897_v61, %v312_v42  ;;  %420 = vadd.xlane.f32.xlu0 %v419_v45  ;;  %v304_v55 = vadd.f32 %v303_v46, %v169_v26  ;;  %v437_v56 = vsel %vm412_vm3, %v404_v47, 0.0 }
  0xd5   :  { %v698_v57 = vpop.f32.mrf.mxu0  ;;  %v382_v60 = vmax.f32 %v366_v44, 0.0  ;;  %438 = vadd.xlane.f32.xlu1 %v437_v56  ;;  %v413_v3 = vsel %vm412_vm3, %v396_v58, 0.0  ;;  %v336_v6 = vadd.f32 %v335_v53, %v177_v62  ;;  %v706_v7 = vpop.f32.mrf.mxu1  ;;  %v399_v13 = vmul.f32 %v915_v22, %v376_v54 }
  0xd6   :  { %v379_v63 = vmax.f32 %v363_v51, 0.0  ;;  %v361_v0 = vadd.f32 %v897_v61, %v304_v55  ;;  %v315_v1 = vadd.f32 %v698_v57, %v172_v32  ;;  %v397_v4 = vmul.f32 %v915_v22, %v374_v49 }
  0xd7   :  { %v306_v2 = vpop.f32.mrf.mxu0  ;;  %v422_v20 = vsel %vm412_vm3, %v399_v13, 0.0  ;;  %v405_v21 = vmul.f32 %v915_v22, %v382_v60  ;;  %v338_v24 = vpop.f32.mrf.mxu1  ;;  %v344_v26 = vadd.f32 %v705_v37, %v179_v5  ;;  %v369_v14 = vadd.f32 %v897_v61, %v336_v6 }
  0xd8   :  { %v307_v8 = vadd.f32 %v306_v2, %v170_v27  ;;  %414 = vadd.xlane.f32.xlu0 %v413_v3  ;;  %v377_v10 = vmax.f32 %v361_v0, 0.0  ;;  %v364_v11 = vadd.f32 %v897_v61, %v315_v1  ;;  %v416_v12 = vsel %vm412_vm3, %v397_v4, 0.0 }
  0xd9   :  { %417 = vadd.xlane.f32.xlu1 %v416_v12  ;;  %v402_v17 = vmul.f32 %v915_v22, %v379_v63  ;;  %v383_v28 = vmax.f32 %v367_v9, 0.0  ;;  %v368_v29 = vadd.f32 %v897_v61, %v331_v15  ;;  %v180_v30 = vmul.f32 %v753_v16, %v889_v52 }
  0xda   :  { %v380_v18 = vmax.f32 %v364_v11, 0.0  ;;  %v362_v19 = vadd.f32 %v897_v61, %v307_v8  ;;  %v400_v27 = vmul.f32 %v915_v22, %v377_v10  ;;  %v339_v32 = vadd.f32 %v338_v24, %v178_v23 }
  0xdb   :  { %v431_v25 = vsel %vm412_vm3, %v402_v17, 0.0  ;;  %v440_v33 = vsel %vm412_vm3, %v405_v21, 0.0  ;;  %v371_v35 = vadd.f32 %v897_v61, %v344_v26  ;;  %v385_v36 = vmax.f32 %v369_v14, 0.0 }
  0xdc   :  { %423 = vadd.xlane.f32.xlu0 %v422_v20  ;;  %v378_v31 = vmax.f32 %v362_v19, 0.0  ;;  %v403_v34 = vmul.f32 %v915_v22, %v380_v18  ;;  %v425_v37 = vsel %vm412_vm3, %v400_v27, 0.0  ;;  %v406_v38 = vmul.f32 %v915_v22, %v383_v28 }
  0xdd   :  { %432 = vadd.xlane.f32.xlu1 %v431_v25  ;;  %v384_v39 = vmax.f32 %v368_v29, 0.0  ;;  %v347_v40 = vadd.f32 %v706_v7, %v180_v30  ;;  %v370_v52 = vadd.f32 %v897_v61, %v339_v32  ;;  %v387_v43 = vmax.f32 %v371_v35, 0.0 }
  0xde   :  { %v434_v41 = vsel %vm412_vm3, %v403_v34, 0.0  ;;  %v401_v42 = vmul.f32 %v915_v22, %v378_v31  ;;  %v443_v44 = vsel %vm412_vm3, %v406_v38, 0.0  ;;  %v408_v45 = vmul.f32 %v915_v22, %v385_v36 }
  0xdf   :  { %v372_v46 = vadd.f32 %v897_v61, %v347_v40  ;;  %v386_v47 = vmax.f32 %v370_v52, 0.0  ;;  %v407_v49 = vmul.f32 %v915_v22, %v384_v39  ;;  %v410_v51 = vmul.f32 %v915_v22, %v387_v43 }
  0xe0   :  { %441 = vadd.xlane.f32.xlu0 %v440_v33  ;;  %v428_v48 = vsel %vm412_vm3, %v401_v42, 0.0  ;;  %v449_v50 = vsel %vm412_vm3, %v408_v45, 0.0  ;;  %v495_v59 = vlaneseq  ;;  %v988_v4 = vstv %s1055_s6  ;;  %s786_s6 = smov [#allocation3]  }
  0xe1   :  { %426 = vadd.xlane.f32.xlu1 %v425_v37  ;;  %v388_v53 = vmax.f32 %v372_v46, 0.0  ;;  %v446_v54 = vsel %vm412_vm3, %v407_v49, 0.0  ;;  %v409_v55 = vmul.f32 %v915_v22, %v386_v47  ;;  %v455_v56 = vsel %vm412_vm3, %v410_v51, 0.0  ;;  %s614_s13 = sshll.u32 %s786_s6, 4  ;;  %s615_s13 = int_to_ptr.vmem [resolvable:$true] %s614_s13 }
  0xe2   :  { %v980_v62 = vand.u32 127, %v495_v59  ;;  %v983_v3 = vshrl.u32 %v495_v59, 7  ;;  %s762_s14 = scalar_lea.vmem %s615_s13, 16  ;;  %s766_s15 = scalar_lea.vmem %s615_s13, 32 }
  0xe3   :  { %v452_v61 = vsel %vm412_vm3, %v409_v55, 0.0  ;;  %v411_v57 = vmul.f32 %v915_v22, %v388_v53  ;;  %p763_p0 = scmp.ne.s32.totalorder %s615_s13, %s762_s14  ;;  %p767_p1 = scmp.lt.s32.totalorder %s615_s13, %s615_s13 }
  0xe4   :  { %435 = vadd.xlane.f32.xlu0 %v434_v41  ;;  %v501_v1 = vadd.s32 4294967288, %v980_v62  ;;  %v508_v5 = vadd.s32 4294967280, %v980_v62  ;;  %v515_v8 = vadd.s32 4294967272, %v980_v62  ;;  %v499_v10 = vsub.s32 %v980_v62, %v983_v3  ;;  %p768_p2 = scmp.lt.s32.totalorder %s766_s15, %s762_s14 }
  0xe5   :  { %444 = vadd.xlane.f32.xlu1 %v443_v44  ;;  %v458_v58 = vsel %vm412_vm3, %v411_v57, 0.0  ;;  %v550_v12 = vadd.s32 4294967232, %v980_v62  ;;  %v522_v15 = vadd.s32 4294967264, %v980_v62  ;;  %v536_v18 = vadd.s32 4294967248, %v980_v62 }
  0xe6   :  { %v504_v6 = vsub.s32 %v501_v1, %v983_v3  ;;  %v511_v16 = vsub.s32 %v508_v5, %v983_v3  ;;  %v557_v19 = vadd.s32 4294967224, %v980_v62  ;;  %v518_v21 = vsub.s32 %v515_v8, %v983_v3  ;;  %p769_p3 = por %p768_p2, %p767_p1 }
  0xe7   :  { %v543_v24 = vadd.s32 4294967240, %v980_v62  ;;  %v564_v14 = vadd.s32 4294967216, %v980_v62  ;;  %v529_v27 = vadd.s32 4294967256, %v980_v62  ;;  %v553_v28 = vsub.s32 %v550_v12, %v983_v3 }
  0xe8   :  { %429 = vadd.xlane.f32.xlu0 %v428_v48  ;;  %v525_v29 = vsub.s32 %v522_v15, %v983_v3  ;;  %v539_v33 = vsub.s32 %v536_v18, %v983_v3  ;;  %v560_v34 = vsub.s32 %v557_v19, %v983_v3  ;;  %v578_v38 = vadd.s32 4294967200, %v980_v62  ;;  %p770_p4 = pnand %p769_p3, %p763_p0 }
  0xe9   :  { %450 = vadd.xlane.f32.xlu1 %v449_v50  ;;  %v546_v36 = vsub.s32 %v543_v24, %v983_v3  ;;  %v567_v40 = vsub.s32 %v564_v14, %v983_v3  ;;  %v532_v52 = vsub.s32 %v529_v27, %v983_v3  ;;  %v571_v47 = vadd.s32 4294967208, %v980_v62 }
  0xea   :  { %v581_v49 = vsub.s32 %v578_v38, %v983_v3  ;;  %v585_v55 = vadd.s32 4294967192, %v980_v62  ;;  %v592_v59 = vadd.s32 4294967184, %v980_v62 }
  0xec   :  { %447 = vadd.xlane.f32.xlu0 %v446_v54 }
  0xed   :  { %456 = vadd.xlane.f32.xlu1 %v455_v56 }
  0xf0   :  { %453 = vadd.xlane.f32.xlu0 %v452_v61 }
  0xf4   :  { %459 = vadd.xlane.f32.xlu0 %v458_v58 }
 0x15d   :  { %v421_v60 = vpop.xlane.xlu0 %420 }
 0x15e   :  { %v439_v63 = vpop.xlane.xlu1 %438  ;;  %v465_v20 = vadd.f32 %v988_v4, %v421_v60 }
 0x15f   :  { %v471_v48 = vadd.f32 %v988_v4, %v439_v63 }
 0x160   :  { %v512_v35 = vrot.slane %v465_v20, %v511_v16 }
 0x161   :  { %v415_v0 = vpop.xlane.xlu0 %414 }
 0x162   :  { %v418_v2 = vpop.xlane.xlu1 %417  ;;  %v463_v11 = vadd.f32 %v988_v4, %v415_v0  ;;  %v574_v0 = vsub.s32 %v571_v47, %v983_v3 }
 0x163   :  { %v464_v7 = vadd.f32 %v988_v4, %v418_v2  ;;  %v554_v2 = vrot.slane %v471_v48, %v553_v28 }
 0x164   :  { %v500_v25 = vrot.slane %v463_v11, %v499_v10  ;;  %v599_v10 = vadd.s32 4294967176, %v980_v62 }
 0x165   :  { %v424_v22 = vpop.xlane.xlu0 %423  ;;  %v505_v17 = vrot.slane %v464_v7, %v504_v6 }
 0x166   :  { %v433_v9 = vpop.xlane.xlu1 %432  ;;  %v466_v26 = vadd.f32 %v988_v4, %v424_v22  ;;  %v602_v24 = vsub.s32 %v599_v10, %v983_v3 }
 0x167   :  { %v507_v32 = vsel %vm506_vm4, %v505_v17, %v500_v25  ;;  %v469_v42 = vadd.f32 %v988_v4, %v433_v9  ;;  %v588_v9 = vsub.s32 %v585_v55, %v983_v3 }
 0x168   :  { %v519_v39 = vrot.slane %v466_v26, %v518_v21  ;;  %v514_v41 = vsel %vm513_vm5, %v512_v35, %v507_v32 }
 0x169   :  { %v442_v13 = vpop.xlane.xlu0 %441  ;;  %v540_v56 = vrot.slane %v469_v42, %v539_v33 }
 0x16a   :  { %v427_v23 = vpop.xlane.xlu1 %426  ;;  %v521_v51 = vsel %vm520_vm6, %v519_v39, %v514_v41  ;;  %v472_v53 = vadd.f32 %v988_v4, %v442_v13  ;;  %v595_v13 = vsub.s32 %v592_v59, %v983_v3 }
 0x16b   :  { %v467_v30 = vadd.f32 %v988_v4, %v427_v23 }
 0x16c   :  { %v561_v6 = vrot.slane %v472_v53, %v560_v34 }
 0x16d   :  { %v436_v31 = vpop.xlane.xlu0 %435  ;;  %v526_v43 = vrot.slane %v467_v30, %v525_v29 }
 0x16e   :  { %v445_v37 = vpop.xlane.xlu1 %444  ;;  %v470_v45 = vadd.f32 %v988_v4, %v436_v31 }
 0x16f   :  { %v528_v61 = vsel %vm527_vm7, %v526_v43, %v521_v51  ;;  %v473_v57 = vadd.f32 %v988_v4, %v445_v37 }
 0x170   :  { %v547_v60 = vrot.slane %v470_v45, %v546_v36 }
 0x171   :  { %v430_v44 = vpop.xlane.xlu0 %429  ;;  %v568_v11 = vrot.slane %v473_v57, %v567_v40 }
 0x172   :  { %v468_v46 = vadd.f32 %v988_v4, %v430_v44  ;;  %v451_v50 = vpop.xlane.xlu1 %450 }
 0x173   :  { %v475_v5 = vadd.f32 %v988_v4, %v451_v50 }
 0x174   :  { %v533_v54 = vrot.slane %v468_v46, %v532_v52 }
 0x175   :  { %v448_v58 = vpop.xlane.xlu0 %447  ;;  %v582_v19 = vrot.slane %v475_v5, %v581_v49 }
 0x176   :  { %v535_v63 = vsel %vm534_vm8, %v533_v54, %v528_v61  ;;  %v474_v1 = vadd.f32 %v988_v4, %v448_v58  ;;  %v457_v8 = vpop.xlane.xlu1 %456 }
 0x177   :  { %v542_v22 = vsel %vm541_vm9, %v540_v56, %v535_v63  ;;  %v477_v21 = vadd.f32 %v988_v4, %v457_v8 }
 0x178   :  { %v549_v7 = vsel %vm548_vm10, %v547_v60, %v542_v22  ;;  %v575_v17 = vrot.slane %v474_v1, %v574_v0 }
 0x179   :  { %v556_v12 = vsel %vm555_vm11, %v554_v2, %v549_v7  ;;  %v454_v15 = vpop.xlane.xlu0 %453  ;;  %v596_v28 = vrot.slane %v477_v21, %v595_v13 }
 0x17a   :  { %v563_v16 = vsel %vm562_vm12, %v561_v6, %v556_v12  ;;  %v476_v18 = vadd.f32 %v988_v4, %v454_v15 }
 0x17b   :  { %v570_v20 = vsel %vm569_vm13, %v568_v11, %v563_v16 }
 0x17c   :  { %v577_v62 = vsel %vm576_vm14, %v575_v17, %v570_v20  ;;  %v589_v23 = vrot.slane %v476_v18, %v588_v9 }
 0x17d   :  { %v460_v25 = vpop.xlane.xlu0 %459  ;;  %v584_v26 = vsel %vm583_vm15, %v582_v19, %v577_v62 }
 0x17e   :  { %v478_v14 = vadd.f32 %v988_v4, %v460_v25  ;;  %v591_v27 = vsel %vm590_vm0, %v589_v23, %v584_v26 }
 0x17f   :  { %v598_v30 = vsel %vm597_vm1, %v596_v28, %v591_v27 }
 0x180   :  { %v603_v29 = vrot.slane %v478_v14, %v602_v24 }
 0x182   :  { %v605_v31 = vsel %vm604_vm2, %v603_v29, %v598_v30 }
 0x183   :  { %607 = vst [vmem:[#allocation3] sm:$0x1] %v605_v31 }
 0x184   :  { %773 = shalt.err (!%p770_p4)
}
 0x185   :  { %617 = dma.vmem_to_hbm [thread:$0]  %s615_s13, 16, %s1056_s7, [#allocation4]  }
 0x186   :  { %782 = dma.done.wait [#allocation4], 16  }
 0x187   :  { %783 = vsyncadd [#allocation4], 4294967280 }
 0x188   :  { %621 = vsyncpa [#allocation4], 1 }

</bundles_post_ra>
